<compile_context>
chip_gen: v6e
topology: v6e:2x2x1
jax: 0.10.0
libtpu: 0.0.40
codegen_flags: <defaults>
</compile_context>

<pallas_src>
import functools

import jax
import jax.numpy as jnp
from jax.experimental import pallas as pl
from jax.experimental.pallas import tpu as pltpu


_SMALL_BYTES = 64 * 1024              # below this a kernel launch is pure overhead
_MAX_BLOCK_BYTES = 8 * 1024 * 1024    # 8 MiB-class tiles (review item 1/3)
_MAX_LANE_W = 4096                    # widest lane-dense slab we try (review item 4)
_MAX_RAGGED_BYTES = 4 * 1024 * 1024   # single-block fallback cap for odd sizes


def _identity_kernel(x_ref, o_ref):
    # Pure pass-through: copy the current tile.
    o_ref[...] = x_ref[...]


def _pick_lane_width(size: int):
    """Largest multiple of 128 (<= _MAX_LANE_W) that divides the flat size."""
    if size % 128 != 0:
        return None
    cap = min(_MAX_LANE_W, size)        # size and cap are multiples of 128 here
    for w in range(cap, 0, -128):
        if size % w == 0:
            return w
    return 128


def _vmem_limit_bytes(block_bytes: int) -> int:
    # 2 operands x 2 pipeline buffers x block, plus headroom for compiler
    # internal scratch; never request the full physical VMEM (64 MiB on v7x).
    limit = max(4 * block_bytes + (4 << 20), 16 << 20)
    ceiling = 48 << 20
    try:  # generation-aware ceiling (v5e/v6e: 128 MiB, v7x: 64 MiB per TC)
        cap = pltpu.get_tpu_info().vmem_capacity_bytes
        ceiling = min(ceiling, int(cap * 3 // 4))
    except Exception:
        pass
    return int(min(limit, ceiling))


@functools.partial(jax.jit, static_argnames=("rows", "lane_w", "tile_r"))
def _tiled_copy(x, *, rows, lane_w, tile_r):
    """Lane-dense streaming copy; reshapes are bitcasts under jit."""
    itemsize = jnp.dtype(x.dtype).itemsize
    nbytes = x.size * itemsize
    block_bytes = tile_r * lane_w * itemsize
    x2 = x.reshape(rows, lane_w)
    out2 = pl.pallas_call(
        _identity_kernel,
        out_shape=jax.ShapeDtypeStruct((rows, lane_w), x.dtype),
        grid=(pl.cdiv(rows, tile_r),),
        in_specs=[pl.BlockSpec((tile_r, lane_w), lambda i: (i, 0))],
        out_specs=pl.BlockSpec((tile_r, lane_w), lambda i: (i, 0)),
        cost_estimate=pl.CostEstimate(
            flops=0, transcendentals=0, bytes_accessed=2 * nbytes),
        compiler_params=pltpu.CompilerParams(
            dimension_semantics=("parallel",),  # shard across TCs on v7x
            vmem_limit_bytes=_vmem_limit_bytes(block_bytes),
        ),
    )(x2)
    return out2.reshape(x.shape)


@jax.jit
def _whole_block_copy(x):
    """Fallback for sizes not divisible by 128: one full-array block."""
    itemsize = jnp.dtype(x.dtype).itemsize
    size = x.size
    x2 = x.reshape(1, size)
    out2 = pl.pallas_call(
        _identity_kernel,
        out_shape=jax.ShapeDtypeStruct((1, size), x.dtype),
        grid=(1,),
        in_specs=[pl.BlockSpec((1, size), lambda i: (0, 0))],
        out_specs=pl.BlockSpec((1, size), lambda i: (0, 0)),
        cost_estimate=pl.CostEstimate(
            flops=0, transcendentals=0, bytes_accessed=2 * size * itemsize),
        compiler_params=pltpu.CompilerParams(
            dimension_semantics=("arbitrary",),
            vmem_limit_bytes=_vmem_limit_bytes(size * itemsize),
        ),
    )(x2)
    return out2.reshape(x.shape)


def identity(x: jax.Array, *, force_kernel: bool = False) -> jax.Array:
    """Identity forward pass (== the PyTorch module's forward: return x)."""
    size = x.size
    itemsize = jnp.dtype(x.dtype).itemsize
    nbytes = size * itemsize

    # Fast path: no kernel, no data movement (the optimal identity).
    if size == 0 or (not force_kernel and nbytes < _SMALL_BYTES):
        return x

    lane_w = _pick_lane_width(size)
    if lane_w is None:
        # Odd size (not a multiple of 128): honest single-block copy.
        if nbytes <= _MAX_RAGGED_BYTES:
            return _whole_block_copy(x)
        # TODO(synk): chunked (rows,128)+ragged-tail copy for large odd sizes.
        return x

    rows = size // lane_w
    # Dtype-aware sublane multiple: f32 -> 8, bf16 -> 16, int8/fp8 -> 32.
    sub_mult = max(8, 32 // itemsize)
    max_rows = max(
        sub_mult,
        (_MAX_BLOCK_BYTES // (lane_w * itemsize)) // sub_mult * sub_mult,
    )
    tile_r = rows if rows <= max_rows else max_rows  # full dim or aligned tile
    return _tiled_copy(x, rows=rows, lane_w=lane_w, tile_r=tile_r)


if __name__ == "__main__":
    key = jax.random.PRNGKey(0)
    # NCHW: batch=2, channels=4, spatial=16x16
    x = jax.random.normal(key, (2, 4, 16, 16), dtype=jnp.float32)

    # Exercise the Pallas kernel path explicitly (default path bypasses it
    # for an 8 KiB input, which is the faster choice in production).
    y = identity(x, force_kernel=True)
    jax.block_until_ready(y)
    assert y.shape == x.shape and y.dtype == x.dtype
    assert bool(jnp.all(y == x))

    # bf16 input exercises the dtype-aware sublane rounding.
    xb = x.astype(jnp.bfloat16)
    yb = identity(xb, force_kernel=True)
    jax.block_until_ready(yb)
    assert bool(jnp.all(yb == xb))

    # Odd-sized input exercises the full-block fallback path.
    xr = jax.random.normal(jax.random.PRNGKey(1), (3, 5, 7), dtype=jnp.float32)
    yr = identity(xr, force_kernel=True)
    jax.block_until_ready(yr)
    assert bool(jnp.all(yr == xr))

    # Default no-kernel fast path returns the input itself.
    assert identity(x) is x

    print("KERNEL_OK")
</pallas_src>

<mosaic_0001>
module attributes {stable_mosaic.version = 11 : i64} {
  func.func @_identity_kernel(%arg0: i32, %arg1: memref<1x2048xf32, #tpu.memory_space<vmem>>, %arg2: memref<1x2048xf32, #tpu.memory_space<vmem>>) attributes {dimension_semantics = [#tpu.dimension_semantics<parallel>], iteration_bounds = array<i64: 1>, scalar_prefetch = 0 : i64, scratch_operands = 0 : i64, tpu.core_type = #tpu.core_type<tc>, window_params = [{transform_indices = @transform_0, window_bounds = array<i64: 1, 2048>}, {transform_indices = @transform_1, window_bounds = array<i64: 1, 2048>}]} {
    %c0 = arith.constant 0 : index
    %c0_0 = arith.constant 0 : index
    %0 = vector.load %arg1[%c0, %c0_0] : memref<1x2048xf32, #tpu.memory_space<vmem>>, vector<1x2048xf32>
    %c0_1 = arith.constant 0 : index
    %c0_2 = arith.constant 0 : index
    %1 = vector.load %arg2[%c0_1, %c0_2] : memref<1x2048xf32, #tpu.memory_space<vmem>>, vector<1x2048xf32>
    tpu.vector_store %arg2[%c0_1, %c0_2], %0 {strides = array<i32>} : memref<1x2048xf32, #tpu.memory_space<vmem>>, vector<1x2048xf32>,
    return
  }
  func.func @transform_0(%arg0: i32) -> (i32, i32) {
    %c0_i32 = arith.constant 0 : i32
    %c0_i32_0 = arith.constant 0 : i32
    return %arg0, %c0_i32 : i32, i32
  }
  func.func @transform_1(%arg0: i32) -> (i32, i32) {
    %c0_i32 = arith.constant 0 : i32
    %c0_i32_0 = arith.constant 0 : i32
    return %arg0, %c0_i32 : i32, i32
  }
}

</mosaic_0001>

<bundles_post_ra>
// kernel: _tiled_copy.1
= control target key start
LH: loop header
LB: loop body
LE: loop exit
PB: predicated region body
PF: predicated region fallthrough
CT: control target
= control target key end

     0   :  { %s38_s0 = inlined_call_operand.vmem [shape: f32[1,2048], index: 0, kind: input, shape index: {}]   ;;  %s39_s1 = inlined_call_operand.vmem [shape: f32[1,2048], index: 1, kind: output, shape index: {}]  }
   0x1   :  { %v8_v0 = vld [vmem:[%s38_s0] sm:$0xff]  ;;  %v9_v1 = vld [vmem:[%s38_s0 + $0x8] sm:$0xff] }
   0x2   :  { %10 = vst [vmem:[%s39_s1] sm:$0xff] %v8_v0  ;;  %11 = vst [vmem:[%s39_s1 + $0x8] sm:$0xff] %v9_v1 }

</bundles_post_ra>
